<compile_context>
chip_gen: v7x
topology: tpu7x:2x2x1
jax: 0.10.0
libtpu: 0.0.40
codegen_flags: <defaults>
</compile_context>

<pallas_src>
import functools

import jax
import jax.numpy as jnp
from jax import lax
from jax.experimental import pallas as pl
from jax.experimental.pallas import tpu as pltpu

LANE = 128
TILE_M = 4096                       # rows / grid step: 4096*128*4 B = 2 MiB per input
FUSED_MAX_ELEMS = 512 * 1024        # fused path gate (inputs + f32 temps ~<= 12 MiB VMEM)
VMEM_LIMIT = 32 * 1024 * 1024       # safe scoped-VMEM limit on v5e/v6e/v7x


def _num_tensorcores():
    """TensorCores a single Pallas 'parallel' axis can shard across (heuristic)."""
    try:
        kind = jax.devices()[0].device_kind.lower()
    except Exception:
        return 1
    if ("v4" in kind) or ("v5p" in kind) or ("v7" in kind) or ("7x" in kind):
        return 2
    return 1


# --------------------------------------------------------------------------
# Fused single-pass kernel (small / medium inputs fully resident in VMEM).
# --------------------------------------------------------------------------
def _fused_kernel(p_ref, t_ref, o_ref, *, inv_n):
    diff = jnp.abs(t_ref[...].astype(jnp.float32) - p_ref[...].astype(jnp.float32))
    row_max = jnp.max(diff, axis=0, keepdims=True)            # (1, LANE)
    c = 0.2 * jnp.max(row_max, axis=1, keepdims=True)         # (1, 1)
    inv_2c = 0.5 / c                                           # (1, 1); inf iff c == 0
    loss = jnp.where(diff <= c, diff, (diff * diff + c * c) * inv_2c)
    row_sum = jnp.sum(loss, axis=0, keepdims=True)             # (1, LANE)
    o_ref[...] = jnp.sum(row_sum, axis=1, keepdims=True) * inv_n


def _berhu_fused(p2, t2, n):
    out = pl.pallas_call(
        functools.partial(_fused_kernel, inv_n=1.0 / n),
        out_shape=jax.ShapeDtypeStruct((1, 1), jnp.float32),
        in_specs=[pl.BlockSpec(memory_space=pltpu.MemorySpace.VMEM),
                  pl.BlockSpec(memory_space=pltpu.MemorySpace.VMEM)],
        out_specs=pl.BlockSpec(memory_space=pltpu.MemorySpace.VMEM),
        compiler_params=pltpu.CompilerParams(vmem_limit_bytes=VMEM_LIMIT),
    )(p2, t2)
    return out[0, 0]


# --------------------------------------------------------------------------
# Streaming two-pass kernels (large inputs).
# --------------------------------------------------------------------------
def _row_valid(b, tile_m, m):
    # (tile_m, 1) validity mask, broadcast across lanes where used.
    rows = b * tile_m + lax.broadcasted_iota(jnp.int32, (tile_m, 1), 0)
    return rows < m


def _max_kernel(p_ref, t_ref, o_ref, *, nt, tile_m, m, edge_start):
    @pl.when(pl.program_id(1) == 0)
    def _():
        o_ref[...] = jnp.zeros_like(o_ref)   # diff >= 0, so 0 is the max identity

    diff = jnp.abs(t_ref[...].astype(jnp.float32) - p_ref[...].astype(jnp.float32))

    if edge_start is None:                   # no tail / duplicate block anywhere
        o_ref[...] = jnp.maximum(o_ref[...], jnp.max(diff, axis=0, keepdims=True))
    else:
        b = pl.program_id(0) * nt + pl.program_id(1)   # unclamped block index

        @pl.when(b < edge_start)             # interior tiles: no masking work at all
        def _():
            o_ref[...] = jnp.maximum(o_ref[...],
                                     jnp.max(diff, axis=0, keepdims=True))

        @pl.when(b >= edge_start)            # ragged tail / clamped duplicate block
        def _():
            d = jnp.where(_row_valid(b, tile_m, m), diff, 0.0)
            o_ref[...] = jnp.maximum(o_ref[...], jnp.max(d, axis=0, keepdims=True))


def _sum_kernel(cp_ref, p_ref, t_ref, o_ref, *, nt, tile_m, m, edge_start):
    @pl.when(pl.program_id(1) == 0)
    def _():
        o_ref[...] = jnp.zeros_like(o_ref)

    c = cp_ref[0]            # SMEM scalars, computed once in the wrapper
    inv_2c = cp_ref[1]

    diff = jnp.abs(t_ref[...].astype(jnp.float32) - p_ref[...].astype(jnp.float32))
    loss = jnp.where(diff <= c, diff, (diff * diff + c * c) * inv_2c)

    if edge_start is None:
        o_ref[...] += jnp.sum(loss, axis=0, keepdims=True)
    else:
        b = pl.program_id(0) * nt + pl.program_id(1)

        @pl.when(b < edge_start)
        def _():
            o_ref[...] += jnp.sum(loss, axis=0, keepdims=True)

        @pl.when(b >= edge_start)
        def _():
            masked = jnp.where(_row_valid(b, tile_m, m), loss, 0.0)
            o_ref[...] += jnp.sum(masked, axis=0, keepdims=True)


def _berhu_streaming(p2, t2, n, m):
    nc = _num_tensorcores()
    tile_m = TILE_M if m >= TILE_M else m          # full-dim block if small
    nb = pl.cdiv(m, tile_m)                        # total row blocks
    if nb < 2:
        nc = 1
    nt = pl.cdiv(nb, nc)                           # steps per core

    ragged = (nb * tile_m != m)                    # last real block hangs off the array
    dup = (nc * nt != nb)                          # a core gets a clamped duplicate block
    edge_start = (nb - 1) if ragged else (nb if dup else None)

    def data_map(c_, i_):
        # Contiguous per-core split; clamp so the DMA never starts fully OOB
        # (the duplicated block is zero-masked in the kernel).
        return (jnp.minimum(c_ * nt + i_, nb - 1), 0)

    data_spec = pl.BlockSpec((tile_m, LANE), data_map)
    acc_spec = pl.BlockSpec((None, 1, LANE), lambda c_, i_: (c_, 0, 0))
    acc_shape = jax.ShapeDtypeStruct((nc, 1, LANE), jnp.float32)
    cparams = pltpu.CompilerParams(
        dimension_semantics=("parallel", "arbitrary"),
        vmem_limit_bytes=VMEM_LIMIT)
    statics = dict(nt=nt, tile_m=tile_m, m=m, edge_start=edge_start)

    # Pass 1: per-core (1, 128) partial maxima of |target - pred|.
    max_part = pl.pallas_call(
        functools.partial(_max_kernel, **statics),
        out_shape=acc_shape,
        grid=(nc, nt),
        in_specs=[data_spec, data_spec],
        out_specs=acc_spec,
        compiler_params=cparams,
    )(p2, t2)

    # c and 1/(2c) computed once (tiny), handed to pass 2 as SMEM scalars.
    c = 0.2 * jnp.max(max_part)
    params = jnp.stack([c, 0.5 / c]).astype(jnp.float32)

    # Pass 2: per-core partial sums of the piecewise BerHu term.
    sum_part = pl.pallas_call(
        functools.partial(_sum_kernel, **statics),
        out_shape=acc_shape,
        grid=(nc, nt),
        in_specs=[pl.BlockSpec(memory_space=pltpu.MemorySpace.SMEM),
                  data_spec, data_spec],
        out_specs=acc_spec,
        compiler_params=cparams,
    )(params, p2, t2)

    # .detach() on c is a no-op for the forward pass.
    return jnp.sum(sum_part) / jnp.float32(n)


# --------------------------------------------------------------------------
# Public wrapper.
# --------------------------------------------------------------------------
def berhu_loss(pred, target):
    assert pred.shape == target.shape
    n = pred.size

    p = pred.reshape(-1)
    t = target.reshape(-1)

    # Lane-dense (., 128) view.  Zero-pad only to the next multiple of 128 and
    # only when needed (zero diffs contribute 0 to both the max and the sum).
    pad = (-n) % LANE
    if pad:
        # TODO(synk): a zero-copy ragged-lane path (manual DMA of the flat tail)
        # would avoid this extra HBM copy for very large non-128-multiple numels.
        p = jnp.pad(p, (0, pad))
        t = jnp.pad(t, (0, pad))
    m = (n + pad) // LANE
    p2 = p.reshape(m, LANE)
    t2 = t.reshape(m, LANE)

    if n <= FUSED_MAX_ELEMS:
        return _berhu_fused(p2, t2, n)
    return _berhu_streaming(p2, t2, n, m)


def _berhu_ref(pred, target):
    diff = jnp.abs(target - pred)
    c = 0.2 * jnp.max(diff)
    mask1 = (diff <= c).astype(jnp.float32)
    mask2 = (diff > c).astype(jnp.float32)
    loss1 = diff * mask1
    loss2 = (diff ** 2 + c ** 2) / (2.0 * c) * mask2
    return jnp.mean(loss1 + loss2)


if __name__ == "__main__":
    loss_fn = jax.jit(berhu_loss)

    key = jax.random.PRNGKey(0)
    k1, k2, k3, k4, k5, k6, k7, k8 = jax.random.split(key, 8)

    # 1) Small NCHW depth-estimation style input (fused single-pass path).
    pred = jax.random.uniform(k1, (2, 4, 16, 16), dtype=jnp.float32)
    target = jax.random.uniform(k2, (2, 4, 16, 16), dtype=jnp.float32)
    out = jax.block_until_ready(loss_fn(pred, target))
    ref = jax.block_until_ready(_berhu_ref(pred, target))
    assert jnp.allclose(out, ref, rtol=1e-5, atol=1e-6), (out, ref)

    # 2) Ragged numel (not a multiple of 128) -> exercises the tiny zero-pad path.
    pred = jax.random.uniform(k3, (3, 5, 7, 11), dtype=jnp.float32)
    target = jax.random.uniform(k4, (3, 5, 7, 11), dtype=jnp.float32)
    out = jax.block_until_ready(loss_fn(pred, target))
    ref = jax.block_until_ready(_berhu_ref(pred, target))
    assert jnp.allclose(out, ref, rtol=1e-5, atol=1e-6), (out, ref)

    # 3) Mid-size image-like input (still fused).
    pred = jax.random.uniform(k5, (2, 4, 128, 160), dtype=jnp.float32)
    target = jax.random.uniform(k6, (2, 4, 128, 160), dtype=jnp.float32)
    out = jax.block_until_ready(loss_fn(pred, target))
    ref = jax.block_until_ready(_berhu_ref(pred, target))
    assert jnp.allclose(out, ref, rtol=1e-5, atol=1e-6), (out, ref)

    # 4) Larger input: exercises the two-pass streaming kernels, the ragged
    #    tail-block masking and (on megacore chips) the parallel core axis.
    pred = jax.random.uniform(k7, (2, 1, 1000, 768), dtype=jnp.float32)
    target = jax.random.uniform(k8, (2, 1, 1000, 768), dtype=jnp.float32)
    out = jax.block_until_ready(loss_fn(pred, target))
    ref = jax.block_until_ready(_berhu_ref(pred, target))
    assert jnp.allclose(out, ref, rtol=1e-4, atol=1e-6), (out, ref)

    print("KERNEL_OK")
</pallas_src>

<mosaic_0001>
module attributes {stable_mosaic.version = 11 : i64} {
  func.func @_fused_kernel(%arg0: memref<16x128xf32, #tpu.memory_space<vmem>>, %arg1: memref<16x128xf32, #tpu.memory_space<vmem>>, %arg2: memref<1x1xf32, #tpu.memory_space<vmem>>) attributes {dimension_semantics = [], scalar_prefetch = 0 : i64, scratch_operands = 0 : i64, tpu.core_type = #tpu.core_type<tc>} {
    %c0 = arith.constant 0 : index
    %c0_0 = arith.constant 0 : index
    %0 = vector.load %arg1[%c0, %c0_0] : memref<16x128xf32, #tpu.memory_space<vmem>>, vector<16x128xf32>
    %c0_1 = arith.constant 0 : index
    %c0_2 = arith.constant 0 : index
    %1 = vector.load %arg0[%c0_1, %c0_2] : memref<16x128xf32, #tpu.memory_space<vmem>>, vector<16x128xf32>
    %2 = arith.subf %0, %1 : vector<16x128xf32>
    %3 = math.absf %2 : vector<16x128xf32>
    %cst = arith.constant dense<0xFF800000> : vector<128xf32>
    %4 = vector.multi_reduction <maximumf>, %3, %cst [0] : vector<16x128xf32> to vector<128xf32>
    %5 = vector.shape_cast %4 : vector<128xf32> to vector<1x128xf32>
    %cst_3 = arith.constant dense<0xFF800000> : vector<1xf32>
    %6 = vector.multi_reduction <maximumf>, %5, %cst_3 [1] : vector<1x128xf32> to vector<1xf32>
    %7 = vector.shape_cast %6 : vector<1xf32> to vector<1x1xf32>
    %cst_4 = arith.constant 2.000000e-01 : f32
    %8 = vector.broadcast %cst_4 : f32 to vector<1x1xf32>
    %9 = arith.mulf %8, %7 : vector<1x1xf32>
    %cst_5 = arith.constant 5.000000e-01 : f32
    %10 = vector.broadcast %cst_5 : f32 to vector<1x1xf32>
    %11 = arith.divf %10, %9 : vector<1x1xf32>
    %12 = vector.broadcast %9 : vector<1x1xf32> to vector<16x128xf32>
    %13 = arith.cmpf ole, %3, %12 : vector<16x128xf32>
    %14 = arith.mulf %3, %3 : vector<16x128xf32>
    %15 = arith.mulf %9, %9 : vector<1x1xf32>
    %16 = vector.broadcast %15 : vector<1x1xf32> to vector<16x128xf32>
    %17 = arith.addf %14, %16 : vector<16x128xf32>
    %18 = vector.broadcast %11 : vector<1x1xf32> to vector<16x128xf32>
    %19 = arith.mulf %17, %18 : vector<16x128xf32>
    %20 = arith.select %13, %3, %19 : vector<16x128xi1>, vector<16x128xf32>
    %cst_6 = arith.constant dense<0.000000e+00> : vector<128xf32>
    %21 = vector.multi_reduction <add>, %20, %cst_6 [0] : vector<16x128xf32> to vector<128xf32>
    %22 = vector.shape_cast %21 : vector<128xf32> to vector<1x128xf32>
    %cst_7 = arith.constant dense<0.000000e+00> : vector<1xf32>
    %23 = vector.multi_reduction <add>, %22, %cst_7 [1] : vector<1x128xf32> to vector<1xf32>
    %24 = vector.shape_cast %23 : vector<1xf32> to vector<1x1xf32>
    %cst_8 = arith.constant 4.8828125E-4 : f32
    %25 = vector.broadcast %cst_8 : f32 to vector<1x1xf32>
    %26 = arith.mulf %24, %25 : vector<1x1xf32>
    %c0_9 = arith.constant 0 : index
    %c0_10 = arith.constant 0 : index
    %27 = vector.load %arg2[%c0_9, %c0_10] : memref<1x1xf32, #tpu.memory_space<vmem>>, vector<1x1xf32>
    tpu.vector_store %arg2[%c0_9, %c0_10], %26 {strides = array<i32>} : memref<1x1xf32, #tpu.memory_space<vmem>>, vector<1x1xf32>,
    return
  }
}

</mosaic_0001>

<bundles_post_ra>
// kernel: berhu_loss.1
= control target key start
LH: loop header
LB: loop body
LE: loop exit
PB: predicated region body
PF: predicated region fallthrough
CT: control target
= control target key end

     0   :  { %s136_s0 = inlined_call_operand.vmem [shape: f32[16,128], index: 0, kind: input, shape index: {}]   ;;  %s137_s1 = inlined_call_operand.vmem [shape: f32[16,128], index: 1, kind: input, shape index: {}]   ;;  %s138_s2 = inlined_call_operand.hbm [shape: f32[1,1], index: 2, kind: output, shape index: {}]  }
   0x1   :  { %v12_v0 = vld [vmem:[%s137_s1] sm:$0xff]  ;;  %v13_v1 = vld [vmem:[%s137_s1 + $0x8] sm:$0xff] }
   0x2   :  { %v14_v2 = vld [vmem:[%s136_s0] sm:$0xff]  ;;  %v15_v3 = vld [vmem:[%s136_s0 + $0x8] sm:$0xff] }
   0x3   :  { %v16_v4 = vsub.f32 %v12_v0, %v14_v2 }
   0x4   :  { %7 = vsyncpa [#allocation3], 0  ;;  %v17_v5 = vsub.f32 %v13_v1, %v15_v3  ;;  %s96_s0 = smov [#allocation2]   ;;  %vm53_vm2 = vcmask 0  }
   0x5   :  { %v18_v6 = vand.u32 2147483647, %v16_v4  ;;  %s61_s1 = sshll.u32 %s96_s0, 4  ;;  %s62_s1 = int_to_ptr.vmem [resolvable:$true] %s61_s1 }
   0x6   :  { %v19_v7 = vand.u32 2147483647, %v17_v5  ;;  %s72_s17 = scalar_lea.vmem %s62_s1, 16  ;;  %s76_s18 = scalar_lea.vmem %s62_s1, 32 }
   0x7   :  { %v34_v17 = vmul.f32 %v18_v6, %v18_v6  ;;  %p73_p0 = scmp.ne.s32.totalorder %s62_s1, %s72_s17  ;;  %p77_p1 = scmp.lt.s32.totalorder %s62_s1, %s62_s1 }
   0x8   :  { %v20_v8 = vmax.f32 %v18_v6, %v19_v7  ;;  %v35_v18 = vmul.f32 %v19_v7, %v19_v7  ;;  %p78_p2 = scmp.lt.s32.totalorder %s76_s18, %s72_s17 }
   0xa   :  { %v21_v9 = vrot.slane %v20_v8, 4  ;;  %p79_p3 = por %p78_p2, %p77_p1 }
   0xc   :  { %v22_v10 = vmax.f32 %v20_v8, %v21_v9  ;;  %p80_p4 = pnand %p79_p3, %p73_p0 }
   0xe   :  { %v23_v11 = vrot.slane %v22_v10, 2 }
  0x10   :  { %v24_v12 = vmax.f32 %v22_v10, %v23_v11 }
  0x12   :  { %v25_v13 = vrot.slane %v24_v12, 1 }
  0x14   :  { %v26_v14 = vmax.f32 %v24_v12, %v25_v13 }
  0x16   :  { %27 = vmax.xlane.f32.xlu0 %v26_v14 }
  0xa3   :  { %v28_v15 = vpop.xlane.xlu0 %27 }
  0xa4   :  { %v29_v16 = vmul.f32 0.2, %v28_v15 }
  0xa6   :  { %70 = vrcp.f32 %v29_v16  ;;  %v36_v19 = vmul.f32 %v29_v16, %v29_v16  ;;  %vm32_vm0 = vcmp.le.f32.partialorder %v18_v6, %v29_v16  ;;  %vm33_vm1 = vcmp.le.f32.partialorder %v19_v7, %v29_v16 }
  0xa8   :  { %v37_v22 = vadd.f32 %v36_v19, %v34_v17  ;;  %v38_v23 = vadd.f32 %v36_v19, %v35_v18 }
  0xb0   :  { %v71_v20 = vpop.eup %70 }
  0xb1   :  { %v31_v21 = vmul.f32 0.5, %v71_v20 }
  0xb3   :  { %v39_v24 = vmul.f32 %v37_v22, %v31_v21  ;;  %v40_v25 = vmul.f32 %v38_v23, %v31_v21 }
  0xb5   :  { %v41_v26 = vsel %vm32_vm0, %v18_v6, %v39_v24  ;;  %v42_v27 = vsel %vm33_vm1, %v19_v7, %v40_v25 }
  0xb6   :  { %v43_v28 = vadd.f32 %v42_v27, %v41_v26 }
  0xb8   :  { %v44_v29 = vrot.slane %v43_v28, 4 }
  0xba   :  { %v45_v30 = vadd.f32 %v44_v29, %v43_v28 }
  0xbc   :  { %v46_v31 = vrot.slane %v45_v30, 2 }
  0xbe   :  { %v47_v32 = vadd.f32 %v46_v31, %v45_v30 }
  0xc0   :  { %v48_v33 = vrot.slane %v47_v32, 1 }
  0xc2   :  { %v49_v34 = vadd.f32 %v48_v33, %v47_v32 }
  0xc4   :  { %50 = vadd.xlane.f32.xlu0 %v49_v34 }
 0x151   :  { %v51_v35 = vpop.xlane.xlu0 %50 }
 0x152   :  { %v52_v36 = vmul.f32 0.00048828125, %v51_v35 }
 0x154   :  { %54 = vst.msk [vmem:[#allocation2] sm:$0x1] %vm53_vm2, %v52_v36 }
 0x155   :  { %83 = shalt.err (!%p80_p4)
}
 0x156   :  { %s84_s21 = scalar_lea.hbm %s138_s2, 16 }
 0x157   :  { %p85_p5 = scmp.ne.s32.totalorder %s138_s2, %s84_s21  ;;  %p88_p6 = scmp.lt.u32.totalorder %s84_s21, %s138_s2 }
 0x159   :  { %p90_p7 = pnand %p88_p6, %p85_p5 }
 0x15b   :  { %93 = shalt.err (!%p90_p7)
}
 0x15c   :  { %64 = dma.vmem_to_hbm [thread:$0]  %s62_s1, 16, %s138_s2, [#allocation3]  }
 0x15d   :  { %94 = dma.done.wait [#allocation3], 16  }
 0x15e   :  { %95 = vsyncadd [#allocation3], 4294967280 }
 0x15f   :  { %68 = vsyncpa [#allocation3], 1 }

</bundles_post_ra>
